<compile_context>
chip_gen: v7x
topology: tpu7x:2x2x1
jax: 0.10.0
libtpu: 0.0.40
codegen_flags: <defaults>
</compile_context>

<pallas_src>
import functools

import jax
import jax.numpy as jnp
from jax.experimental import pallas as pl
from jax.experimental.pallas import tpu as pltpu

BN_EPS = 1e-5


# ------------------------------------------------------------------ kernel

def _gnn_kernel(h0_ref, vn0_ref, pt_ref, ssrc_ref, ssrc_pt_ref, adst_ref,
                pool_ref, counts_ref, eps_ref, eemb_ref,
                w1_ref, b1_ref, w2_ref, b2_ref,
                vw1_ref, vb1_ref, vw2_ref, vb2_ref,
                hout_ref, vn_sc, *, num_layers):
    """One grid step == one full GNN layer; h stays in hout_ref, vn in scratch.

    h_new  = [ReLU] BNout( W2( ReLU( BN1( W1( (1+eps)*h' + scatter(relu(h'[src]+eemb)) )))))
    vn_new = ReLU( BN2( W2v( ReLU( BN1v( W1v( SumPool(h') + vn ))))))   (not last layer)
    with h' = h + P^T @ vn, and all eval-mode BNs pre-folded into W/b.
    """
    f32, bf16 = jnp.float32, jnp.bfloat16
    layer = pl.program_id(0)
    is_last = layer == num_layers - 1

    @pl.when(layer == 0)
    def _():
        hout_ref[...] = h0_ref[...]
        vn_sc[...] = vn0_ref[...]

    h = hout_ref[...]                       # f32 [N, HP], previous layer's output
    vn = vn_sc[...]                         # f32 [B, HP]
    hb = h.astype(bf16)
    vnb = vn.astype(bf16)

    # h' = h + P^T @ vn (virtual-node broadcast add).
    h_prime = h + jnp.dot(pt_ref[...], vnb, preferred_element_type=f32)

    # GIN message passing with dense 0/1 operators (operators exact in bf16;
    # the hb/vnb/msg bf16 rounding ~2^-9 is the actual error source).
    # gather(h')[src] = ssrc@h + (ssrc P^T)@vn -> independent of the pass above.
    hsrc = (jnp.dot(ssrc_ref[...], hb, preferred_element_type=f32)
            + jnp.dot(ssrc_pt_ref[...], vnb, preferred_element_type=f32))
    msg = jnp.maximum(hsrc + eemb_ref[...], 0.0)                         # [E, HP]
    agg = jnp.dot(adst_ref[...], msg.astype(bf16), preferred_element_type=f32)
    pre = (1.0 + eps_ref[...]) * h_prime + agg                           # [N, HP]

    # GIN MLP (BN1 / outer BN folded): Linear -> ReLU -> Linear [-> ReLU unless last].
    z = jnp.maximum(
        jnp.dot(pre.astype(bf16), w1_ref[...], preferred_element_type=f32) + b1_ref[...],
        0.0)
    hn = jnp.dot(z.astype(bf16), w2_ref[...], preferred_element_type=f32) + b2_ref[...]

    @pl.when(is_last)
    def _():
        hout_ref[...] = hn

    @pl.when(layer < num_layers - 1)
    def _():
        hout_ref[...] = jnp.maximum(hn, 0.0)
        # vn_new = MLP_vn(SumPool(h') + vn);  SumPool(h') = pool@h + counts*vn.
        pooled = (jnp.dot(pool_ref[...], hb, preferred_element_type=f32)
                  + (counts_ref[...] + 1.0) * vn)
        zv = jnp.maximum(
            jnp.dot(pooled.astype(bf16), vw1_ref[...], preferred_element_type=f32)
            + vb1_ref[...], 0.0)
        vn_sc[...] = jnp.maximum(
            jnp.dot(zv.astype(bf16), vw2_ref[...], preferred_element_type=f32)
            + vb2_ref[...], 0.0)


def fused_gnn(h0, vn0, pt, ssrc, ssrc_pt, adst, pool, counts,
              eps, eemb, w1, b1, w2, b2, vw1, vb1, vw2, vb2):
    num_layers = eps.shape[0]
    n, hp = h0.shape

    def whole(x):                 # graph-constant operand: one block, fetched once
        return pl.BlockSpec(x.shape, lambda l: (0,) * x.ndim)

    def per_layer(x):             # [L, ...] stacked operand: one block per layer
        return pl.BlockSpec((None,) + x.shape[1:],
                            lambda l: (l,) + (0,) * (x.ndim - 1))

    return pl.pallas_call(
        functools.partial(_gnn_kernel, num_layers=num_layers),
        out_shape=jax.ShapeDtypeStruct((n, hp), jnp.float32),
        grid=(num_layers,),
        in_specs=[whole(h0), whole(vn0), whole(pt), whole(ssrc), whole(ssrc_pt),
                  whole(adst), whole(pool), whole(counts),
                  per_layer(eps), per_layer(eemb),
                  per_layer(w1), per_layer(b1), per_layer(w2), per_layer(b2),
                  per_layer(vw1), per_layer(vb1), per_layer(vw2), per_layer(vb2)],
        out_specs=pl.BlockSpec((n, hp), lambda l: (0, 0)),   # constant -> VMEM-resident h
        scratch_shapes=[pltpu.VMEM(vn0.shape, jnp.float32)],  # vn carried across layers
        compiler_params=pltpu.CompilerParams(dimension_semantics=("arbitrary",)),
    )(h0, vn0, pt, ssrc, ssrc_pt, adst, pool, counts,
      eps, eemb, w1, b1, w2, b2, vw1, vb1, vw2, vb2)


# ----------------------------------------------- host-side param preparation

def _fold_bn(w, b, g, beta, m, v):
    """Fold an eval-mode BatchNorm into the preceding Linear (scale once)."""
    s = g * jax.lax.rsqrt(v + BN_EPS)
    return w * s[None, :], (b - m) * s + beta


def _pad_mat(w, hp):
    hin, hout = w.shape
    return jnp.pad(w, ((0, hp - hin), (0, hp - hout)))


def _pad_vec(b, hp):
    return jnp.pad(b, (0, hp - b.shape[0])).reshape(1, hp)


def prepare_params(params, hp):
    """Fold BNs into the linears, zero-pad to HP lanes, stack over layers."""
    num_layers = len(params["layers"])
    hidden = params["layers"][0]["w1"].shape[0]

    w1l, b1l, w2l, b2l, epsl, bond_tables = [], [], [], [], [], []
    for lp in params["layers"]:
        # NOTE: fold BEFORE pad so padded bias lanes stay exactly zero.
        w1, b1 = _fold_bn(lp["w1"], lp["b1"], lp["bn1_g"], lp["bn1_b"], lp["bn1_m"], lp["bn1_v"])
        w2, b2 = _fold_bn(lp["w2"], lp["b2"], lp["out_bn_g"], lp["out_bn_b"],
                          lp["out_bn_m"], lp["out_bn_v"])
        w1l.append(_pad_mat(w1, hp)); b1l.append(_pad_vec(b1, hp))
        w2l.append(_pad_mat(w2, hp)); b2l.append(_pad_vec(b2, hp))
        epsl.append(lp["eps"].reshape(1, 1))
        bond_tables.append(lp["bond_tables"])

    vw1l, vb1l, vw2l, vb2l = [], [], [], []
    for vp in params["vn_mlps"]:
        w1, b1 = _fold_bn(vp["w1"], vp["b1"], vp["bn1_g"], vp["bn1_b"], vp["bn1_m"], vp["bn1_v"])
        w2, b2 = _fold_bn(vp["w2"], vp["b2"], vp["bn2_g"], vp["bn2_b"], vp["bn2_m"], vp["bn2_v"])
        vw1l.append(_pad_mat(w1, hp)); vb1l.append(_pad_vec(b1, hp))
        vw2l.append(_pad_mat(w2, hp)); vb2l.append(_pad_vec(b2, hp))
    # Pad virtual-node stacks to num_layers entries (last entry unused, gated by pl.when).
    zw, zb = jnp.zeros((hp, hp), jnp.float32), jnp.zeros((1, hp), jnp.float32)
    while len(vw1l) < num_layers:
        vw1l.append(zw); vb1l.append(zb); vw2l.append(zw); vb2l.append(zb)

    bf16 = jnp.bfloat16
    prepped = dict(
        atom_tables=params["atom_tables"], vn_emb=params["vn_emb"],
        bond_tables=bond_tables,
        eps=jnp.stack(epsl),                                  # [L, 1, 1] f32
        # bf16 weights: half the HBM->VMEM bytes + native MXU rate; biases stay f32.
        w1=jnp.stack(w1l).astype(bf16), b1=jnp.stack(b1l),
        w2=jnp.stack(w2l).astype(bf16), b2=jnp.stack(b2l),
        vw1=jnp.stack(vw1l).astype(bf16), vb1=jnp.stack(vb1l),
        vw2=jnp.stack(vw2l).astype(bf16), vb2=jnp.stack(vb2l))
    # Padding invariant: pad lanes of the (BN-folded) biases must be exactly zero.
    assert float(jnp.max(jnp.abs(prepped["b1"][:, :, hidden:]))) == 0.0
    assert float(jnp.max(jnp.abs(prepped["b2"][:, :, hidden:]))) == 0.0
    return prepped


# ----------------------------------------------------------- full forward

def forward_pallas(prepped, graph, rand_x, rand_edge, *, hidden, hp):
    node_feat, edge_feat = graph["node_feat"], graph["edge_feat"]
    num_batch = graph["pool"].shape[0]

    # AtomEncoder (embedding gathers stay in plain-JAX glue) + random node feats.
    atom_emb = sum(jnp.take(t, node_feat[:, k], axis=0)
                   for k, t in enumerate(prepped["atom_tables"]))
    h0 = jnp.pad(jnp.concatenate([atom_emb, rand_x], axis=-1),
                 ((0, 0), (0, hp - hidden)))                       # [N, HP] lane-dense
    vn0 = jnp.pad(jnp.tile(prepped["vn_emb"], (num_batch, 1)),
                  ((0, 0), (0, hp - hidden)))                      # [B, HP]

    # BondEncoder for all layers, stacked + padded once -> [L, E, HP].
    eembs = [sum(jnp.take(t, edge_feat[:, k], axis=0) for k, t in enumerate(tabs))
             for tabs in prepped["bond_tables"]]
    eemb = jnp.pad(
        jnp.stack([jnp.concatenate([e, rand_edge], axis=-1) for e in eembs]),
        ((0, 0), (0, 0), (0, hp - hidden)))

    h = fused_gnn(h0, vn0, graph["pt"], graph["ssrc"], graph["ssrc_pt"],
                  graph["adst"], graph["pool"], graph["counts"],
                  prepped["eps"], eemb,
                  prepped["w1"], prepped["b1"], prepped["w2"], prepped["b2"],
                  prepped["vw1"], prepped["vb1"], prepped["vw2"], prepped["vb2"])
    return h[:, :hidden], None                                     # JK == 'last'


# ----------------------------------------------------- plain-JAX reference

def forward_reference(params, graph, rand_x, rand_edge):
    node_feat, edge_feat = graph["node_feat"], graph["edge_feat"]
    src, dst, batch_id = graph["src"], graph["dst"], graph["batch_id"]
    num_nodes = node_feat.shape[0]
    num_batch = int(batch_id.max()) + 1

    def bn(x, g, b, m, v):
        return (x - m) * (g / jnp.sqrt(v + BN_EPS)) + b

    atom_emb = sum(jnp.take(t, node_feat[:, k], axis=0)
                   for k, t in enumerate(params["atom_tables"]))
    h = jnp.concatenate([atom_emb, rand_x], axis=-1)
    vn = jnp.tile(params["vn_emb"], (num_batch, 1))

    num_layers = len(params["layers"])
    for layer in range(num_layers):
        lp = params["layers"][layer]
        h = h + vn[batch_id]
        bond_emb = sum(jnp.take(t, edge_feat[:, k], axis=0)
                       for k, t in enumerate(lp["bond_tables"]))
        eemb = jnp.concatenate([bond_emb, rand_edge], axis=-1)
        msg = jax.nn.relu(h[src] + eemb)
        agg = jax.ops.segment_sum(msg, dst, num_segments=num_nodes)
        pre = (1.0 + lp["eps"]) * h + agg
        z = jax.nn.relu(bn(pre @ lp["w1"] + lp["b1"],
                           lp["bn1_g"], lp["bn1_b"], lp["bn1_m"], lp["bn1_v"]))
        h_conv = z @ lp["w2"] + lp["b2"]
        h_new = bn(h_conv, lp["out_bn_g"], lp["out_bn_b"],
                   lp["out_bn_m"], lp["out_bn_v"])
        if layer != num_layers - 1:
            h_new = jax.nn.relu(h_new)
        if layer < num_layers - 1:
            vp = params["vn_mlps"][layer]
            pooled = jax.ops.segment_sum(h, batch_id, num_segments=num_batch) + vn
            z = jax.nn.relu(bn(pooled @ vp["w1"] + vp["b1"],
                               vp["bn1_g"], vp["bn1_b"], vp["bn1_m"], vp["bn1_v"]))
            z = z @ vp["w2"] + vp["b2"]
            vn = jax.nn.relu(bn(z, vp["bn2_g"], vp["bn2_b"], vp["bn2_m"], vp["bn2_v"]))
        h = h_new
    return h, None


# ------------------------------------------------------------- param init

def init_params(key, num_layers, hidden, rvd, atom_vocab, bond_vocab):
    emb_dim = hidden - rvd
    keys = iter(jax.random.split(key, 512))

    def dense(shape, scale=0.1):
        return scale * jax.random.normal(next(keys), shape, jnp.float32)

    def bn_params(h):
        return dict(g=1.0 + 0.1 * jax.random.normal(next(keys), (h,), jnp.float32),
                    b=dense((h,)),
                    m=dense((h,)),
                    v=jax.random.uniform(next(keys), (h,), jnp.float32, 0.5, 1.5))

    params = {
        "atom_tables": [dense((v, emb_dim)) for v in atom_vocab],
        "vn_emb": jnp.zeros((1, hidden), jnp.float32),   # nn.init.constant_(0)
        "layers": [],
        "vn_mlps": [],
    }
    for _ in range(num_layers):
        bn1, bno = bn_params(hidden), bn_params(hidden)
        params["layers"].append(dict(
            bond_tables=[dense((v, emb_dim)) for v in bond_vocab],
            eps=jnp.zeros((), jnp.float32),                   # Parameter([0])
            w1=dense((hidden, hidden)), b1=dense((hidden,)),  # stored [in, out]
            bn1_g=bn1["g"], bn1_b=bn1["b"], bn1_m=bn1["m"], bn1_v=bn1["v"],
            w2=dense((hidden, hidden)), b2=dense((hidden,)),
            out_bn_g=bno["g"], out_bn_b=bno["b"], out_bn_m=bno["m"], out_bn_v=bno["v"],
        ))
    for _ in range(num_layers - 1):
        bn1, bn2 = bn_params(hidden), bn_params(hidden)
        params["vn_mlps"].append(dict(
            w1=dense((hidden, hidden)), b1=dense((hidden,)),
            bn1_g=bn1["g"], bn1_b=bn1["b"], bn1_m=bn1["m"], bn1_v=bn1["v"],
            w2=dense((hidden, hidden)), b2=dense((hidden,)),
            bn2_g=bn2["g"], bn2_b=bn2["b"], bn2_m=bn2["m"], bn2_v=bn2["v"],
        ))
    return params


def build_graph(key, nodes_per_graph, num_batch, edges_per_graph,
                atom_vocab, bond_vocab):
    num_nodes = nodes_per_graph * num_batch
    num_edges = edges_per_graph * num_batch
    srcs, dsts = [], []
    for g in range(num_batch):
        kg = jax.random.fold_in(key, g)
        ka, kb = jax.random.split(kg)
        srcs.append(jax.random.randint(ka, (edges_per_graph,), 0, nodes_per_graph)
                    + g * nodes_per_graph)
        dsts.append(jax.random.randint(kb, (edges_per_graph,), 0, nodes_per_graph)
                    + g * nodes_per_graph)
    src = jnp.concatenate(srcs)
    dst = jnp.concatenate(dsts)
    batch_id = jnp.repeat(jnp.arange(num_batch, dtype=jnp.int32), nodes_per_graph)

    kf = jax.random.fold_in(key, 1000)
    node_feat = jnp.stack(
        [jax.random.randint(jax.random.fold_in(kf, k), (num_nodes,), 0, v)
         for k, v in enumerate(atom_vocab)], axis=-1).astype(jnp.int32)
    ke = jax.random.fold_in(key, 2000)
    edge_feat = jnp.stack(
        [jax.random.randint(jax.random.fold_in(ke, k), (num_edges,), 0, v)
         for k, v in enumerate(bond_vocab)], axis=-1).astype(jnp.int32)

    # 0/1 operator matrices are exact in bf16 -> native MXU passes, half the bytes.
    ssrc = jax.nn.one_hot(src, num_nodes, dtype=jnp.bfloat16)             # [E, N]
    adst = jax.nn.one_hot(dst, num_nodes, dtype=jnp.bfloat16).T           # [N, E]
    pool = jax.nn.one_hot(batch_id, num_batch, dtype=jnp.bfloat16).T      # [B, N]
    pt = pool.T                                                           # [N, B]
    ssrc_pt = jax.nn.one_hot(batch_id[src], num_batch, dtype=jnp.bfloat16)  # [E, B] = ssrc @ P^T
    counts = jnp.sum(pool.astype(jnp.float32), axis=1, keepdims=True)     # [B, 1] nodes/graph
    return dict(src=src, dst=dst, batch_id=batch_id,
                node_feat=node_feat, edge_feat=edge_feat,
                ssrc=ssrc, adst=adst, pool=pool, pt=pt,
                ssrc_pt=ssrc_pt, counts=counts)


# ------------------------------------------------------------------- main

if __name__ == "__main__":
    HIDDEN = 32
    HP = 128          # lane-padded hidden (multiple of 128 -> unmasked stores)
    RVD = 8           # random_vec_dim
    NUM_LAYERS = 3
    NUM_BATCH = 2
    NODES_PER_GRAPH = 8
    EDGES_PER_GRAPH = 24
    ATOM_VOCAB = [7, 5]
    BOND_VOCAB = [5, 3]

    key = jax.random.PRNGKey(0)
    kg, kp, kx, ke = jax.random.split(key, 4)

    graph = build_graph(kg, NODES_PER_GRAPH, NUM_BATCH, EDGES_PER_GRAPH,
                        ATOM_VOCAB, BOND_VOCAB)
    params = init_params(kp, NUM_LAYERS, HIDDEN, RVD, ATOM_VOCAB, BOND_VOCAB)
    prepped = prepare_params(params, HP)          # fold BNs + pad + stack, once, on host

    num_nodes = NUM_BATCH * NODES_PER_GRAPH
    num_edges = NUM_BATCH * EDGES_PER_GRAPH
    rand_x = jax.random.normal(kx, (num_nodes, RVD), jnp.float32)
    rand_edge = jax.random.normal(ke, (num_edges, RVD), jnp.float32)

    fwd = jax.jit(functools.partial(forward_pallas, hidden=HIDDEN, hp=HP))
    out, aux = fwd(prepped, graph, rand_x, rand_edge)
    out = jax.block_until_ready(out)
    assert out.shape == (num_nodes, HIDDEN) and aux is None

    ref, _ = forward_reference(params, graph, rand_x, rand_edge)
    # Tolerance sized for fully-bf16 MXU operands (operators exact in bf16,
    # activations/weights round at ~2^-9, compounded over 3 layers x ~7 matmuls).
    max_err = float(jnp.max(jnp.abs(out - ref)))
    scale = float(jnp.max(jnp.abs(ref)))
    tol = max(8e-2, 3e-2 * scale)
    if max_err > tol:
        raise AssertionError(f"Pallas output mismatch, max abs err = {max_err}")

    print("KERNEL_OK")
</pallas_src>

<mosaic_0001>
module attributes {stable_mosaic.version = 11 : i64} {
  func.func @_gnn_kernel(%arg0: i32, %arg1: memref<16x128xf32, #tpu.memory_space<vmem>>, %arg2: memref<2x128xf32, #tpu.memory_space<vmem>>, %arg3: memref<16x2xbf16, #tpu.memory_space<vmem>>, %arg4: memref<48x16xbf16, #tpu.memory_space<vmem>>, %arg5: memref<48x2xbf16, #tpu.memory_space<vmem>>, %arg6: memref<16x48xbf16, #tpu.memory_space<vmem>>, %arg7: memref<2x16xbf16, #tpu.memory_space<vmem>>, %arg8: memref<2x1xf32, #tpu.memory_space<vmem>>, %arg9: memref<1x1x1xf32, #tpu.memory_space<vmem>>, %arg10: memref<1x48x128xf32, #tpu.memory_space<vmem>>, %arg11: memref<1x128x128xbf16, #tpu.memory_space<vmem>>, %arg12: memref<1x1x128xf32, #tpu.memory_space<vmem>>, %arg13: memref<1x128x128xbf16, #tpu.memory_space<vmem>>, %arg14: memref<1x1x128xf32, #tpu.memory_space<vmem>>, %arg15: memref<1x128x128xbf16, #tpu.memory_space<vmem>>, %arg16: memref<1x1x128xf32, #tpu.memory_space<vmem>>, %arg17: memref<1x128x128xbf16, #tpu.memory_space<vmem>>, %arg18: memref<1x1x128xf32, #tpu.memory_space<vmem>>, %arg19: memref<16x128xf32, #tpu.memory_space<vmem>>, %arg20: memref<2x128xf32, #tpu.memory_space<vmem>>) attributes {dimension_semantics = [#tpu.dimension_semantics<arbitrary>], iteration_bounds = array<i64: 3>, scalar_prefetch = 0 : i64, scratch_operands = 1 : i64, tpu.core_type = #tpu.core_type<tc>, window_params = [{pipeline_mode = #tpu.pipeline_mode<synchronous>, transform_indices = @transform_0, window_bounds = array<i64: 16, 128>}, {pipeline_mode = #tpu.pipeline_mode<synchronous>, transform_indices = @transform_1, window_bounds = array<i64: 2, 128>}, {pipeline_mode = #tpu.pipeline_mode<synchronous>, transform_indices = @transform_2, window_bounds = array<i64: 16, 2>}, {pipeline_mode = #tpu.pipeline_mode<synchronous>, transform_indices = @transform_3, window_bounds = array<i64: 48, 16>}, {pipeline_mode = #tpu.pipeline_mode<synchronous>, transform_indices = @transform_4, window_bounds = array<i64: 48, 2>}, {pipeline_mode = #tpu.pipeline_mode<synchronous>, transform_indices = @transform_5, window_bounds = array<i64: 16, 48>}, {pipeline_mode = #tpu.pipeline_mode<synchronous>, transform_indices = @transform_6, window_bounds = array<i64: 2, 16>}, {pipeline_mode = #tpu.pipeline_mode<synchronous>, transform_indices = @transform_7, window_bounds = array<i64: 2, 1>}, {transform_indices = @transform_8, window_bounds = array<i64: 1, 1, 1>}, {transform_indices = @transform_9, window_bounds = array<i64: 1, 48, 128>}, {transform_indices = @transform_10, window_bounds = array<i64: 1, 128, 128>}, {transform_indices = @transform_11, window_bounds = array<i64: 1, 1, 128>}, {transform_indices = @transform_12, window_bounds = array<i64: 1, 128, 128>}, {transform_indices = @transform_13, window_bounds = array<i64: 1, 1, 128>}, {transform_indices = @transform_14, window_bounds = array<i64: 1, 128, 128>}, {transform_indices = @transform_15, window_bounds = array<i64: 1, 1, 128>}, {transform_indices = @transform_16, window_bounds = array<i64: 1, 128, 128>}, {transform_indices = @transform_17, window_bounds = array<i64: 1, 1, 128>}, {pipeline_mode = #tpu.pipeline_mode<synchronous>, transform_indices = @transform_18, window_bounds = array<i64: 16, 128>}]} {
    %c2_i32 = arith.constant 2 : i32
    %0 = arith.cmpi eq, %arg0, %c2_i32 : i32
    %c0_i32 = arith.constant 0 : i32
    %1 = arith.cmpi eq, %arg0, %c0_i32 : i32
    %2 = arith.extui %1 : i1 to i32
    %c0_i32_0 = arith.constant 0 : i32
    %3 = arith.cmpi ne, %2, %c0_i32_0 : i32
    scf.if %3 {
      %c0_41 = arith.constant 0 : index
      %c0_42 = arith.constant 0 : index
      %54 = vector.load %arg1[%c0_41, %c0_42] : memref<16x128xf32, #tpu.memory_space<vmem>>, vector<16x128xf32>
      %c0_43 = arith.constant 0 : index
      %c0_44 = arith.constant 0 : index
      %55 = vector.load %arg19[%c0_43, %c0_44] : memref<16x128xf32, #tpu.memory_space<vmem>>, vector<16x128xf32>
      tpu.vector_store %arg19[%c0_43, %c0_44], %54 {strides = array<i32>} : memref<16x128xf32, #tpu.memory_space<vmem>>, vector<16x128xf32>,
      %c0_45 = arith.constant 0 : index
      %c0_46 = arith.constant 0 : index
      %56 = vector.load %arg2[%c0_45, %c0_46] : memref<2x128xf32, #tpu.memory_space<vmem>>, vector<2x128xf32>
      %c0_47 = arith.constant 0 : index
      %c0_48 = arith.constant 0 : index
      %57 = vector.load %arg20[%c0_47, %c0_48] : memref<2x128xf32, #tpu.memory_space<vmem>>, vector<2x128xf32>
      tpu.vector_store %arg20[%c0_47, %c0_48], %56 {strides = array<i32>} : memref<2x128xf32, #tpu.memory_space<vmem>>, vector<2x128xf32>,
    } else {
    }
    %c0 = arith.constant 0 : index
    %c0_1 = arith.constant 0 : index
    %4 = vector.load %arg19[%c0, %c0_1] : memref<16x128xf32, #tpu.memory_space<vmem>>, vector<16x128xf32>
    %c0_2 = arith.constant 0 : index
    %c0_3 = arith.constant 0 : index
    %5 = vector.load %arg20[%c0_2, %c0_3] : memref<2x128xf32, #tpu.memory_space<vmem>>, vector<2x128xf32>
    %6 = arith.truncf %4 : vector<16x128xf32> to vector<16x128xbf16>
    %7 = arith.truncf %5 : vector<2x128xf32> to vector<2x128xbf16>
    %c0_4 = arith.constant 0 : index
    %c0_5 = arith.constant 0 : index
    %8 = vector.load %arg3[%c0_4, %c0_5] : memref<16x2xbf16, #tpu.memory_space<vmem>>, vector<16x2xbf16>
    %cst = arith.constant dense<0.000000e+00> : vector<16x128xf32>
    %9 = tpu.matmul %8, %7, %cst {dimension_numbers = #tpu.dot_dimension_numbers<[1], [0], [0], [1], [0, 0, 1, 1], [], []>} : vector<16x2xbf16>, vector<2x128xbf16>, vector<16x128xf32> -> vector<16x128xf32>
    %10 = arith.addf %4, %9 : vector<16x128xf32>
    %c0_6 = arith.constant 0 : index
    %c0_7 = arith.constant 0 : index
    %11 = vector.load %arg4[%c0_6, %c0_7] : memref<48x16xbf16, #tpu.memory_space<vmem>>, vector<48x16xbf16>
    %cst_8 = arith.constant dense<0.000000e+00> : vector<48x128xf32>
    %12 = tpu.matmul %11, %6, %cst_8 {dimension_numbers = #tpu.dot_dimension_numbers<[1], [0], [0], [1], [0, 0, 1, 1], [], []>} : vector<48x16xbf16>, vector<16x128xbf16>, vector<48x128xf32> -> vector<48x128xf32>
    %c0_9 = arith.constant 0 : index
    %c0_10 = arith.constant 0 : index
    %13 = vector.load %arg5[%c0_9, %c0_10] : memref<48x2xbf16, #tpu.memory_space<vmem>>, vector<48x2xbf16>
    %cst_11 = arith.constant dense<0.000000e+00> : vector<48x128xf32>
    %14 = tpu.matmul %13, %7, %cst_11 {dimension_numbers = #tpu.dot_dimension_numbers<[1], [0], [0], [1], [0, 0, 1, 1], [], []>} : vector<48x2xbf16>, vector<2x128xbf16>, vector<48x128xf32> -> vector<48x128xf32>
    %15 = arith.addf %12, %14 : vector<48x128xf32>
    %c0_12 = arith.constant 0 : index
    %c0_13 = arith.constant 0 : index
    %c0_14 = arith.constant 0 : index
    %16 = vector.load %arg10[%c0_12, %c0_13, %c0_14] : memref<1x48x128xf32, #tpu.memory_space<vmem>>, vector<1x48x128xf32>
    %17 = vector.shape_cast %16 : vector<1x48x128xf32> to vector<48x128xf32>
    %18 = arith.addf %15, %17 : vector<48x128xf32>
    %cst_15 = arith.constant 0.000000e+00 : f32
    %19 = vector.broadcast %cst_15 : f32 to vector<48x128xf32>
    %20 = arith.maximumf %18, %19 : vector<48x128xf32>
    %c0_16 = arith.constant 0 : index
    %c0_17 = arith.constant 0 : index
    %21 = vector.load %arg6[%c0_16, %c0_17] : memref<16x48xbf16, #tpu.memory_space<vmem>>, vector<16x48xbf16>
    %22 = arith.truncf %20 : vector<48x128xf32> to vector<48x128xbf16>
    %cst_18 = arith.constant dense<0.000000e+00> : vector<16x128xf32>
    %23 = tpu.matmul %21, %22, %cst_18 {dimension_numbers = #tpu.dot_dimension_numbers<[1], [0], [0], [1], [0, 0, 1, 1], [], []>} : vector<16x48xbf16>, vector<48x128xbf16>, vector<16x128xf32> -> vector<16x128xf32>
    %c0_19 = arith.constant 0 : index
    %c0_20 = arith.constant 0 : index
    %c0_21 = arith.constant 0 : index
    %24 = vector.load %arg9[%c0_19, %c0_20, %c0_21] : memref<1x1x1xf32, #tpu.memory_space<vmem>>, vector<1x1x1xf32>
    %25 = vector.shape_cast %24 : vector<1x1x1xf32> to vector<1x1xf32>
    %cst_22 = arith.constant 1.000000e+00 : f32
    %26 = vector.broadcast %cst_22 : f32 to vector<1x1xf32>
    %27 = arith.addf %26, %25 : vector<1x1xf32>
    %28 = vector.broadcast %27 : vector<1x1xf32> to vector<16x128xf32>
    %29 = arith.mulf %28, %10 : vector<16x128xf32>
    %30 = arith.addf %29, %23 : vector<16x128xf32>
    %31 = arith.truncf %30 : vector<16x128xf32> to vector<16x128xbf16>
    %c0_23 = arith.constant 0 : index
    %c0_24 = arith.constant 0 : index
    %c0_25 = arith.constant 0 : index
    %32 = vector.load %arg11[%c0_23, %c0_24, %c0_25] : memref<1x128x128xbf16, #tpu.memory_space<vmem>>, vector<1x128x128xbf16>
    %33 = vector.shape_cast %32 : vector<1x128x128xbf16> to vector<128x128xbf16>
    %cst_26 = arith.constant dense<0.000000e+00> : vector<16x128xf32>
    %34 = tpu.matmul %31, %33, %cst_26 {dimension_numbers = #tpu.dot_dimension_numbers<[1], [0], [0], [1], [0, 0, 1, 1], [], []>} : vector<16x128xbf16>, vector<128x128xbf16>, vector<16x128xf32> -> vector<16x128xf32>
    %c0_27 = arith.constant 0 : index
    %c0_28 = arith.constant 0 : index
    %c0_29 = arith.constant 0 : index
    %35 = vector.load %arg12[%c0_27, %c0_28, %c0_29] : memref<1x1x128xf32, #tpu.memory_space<vmem>>, vector<1x1x128xf32>
    %36 = vector.shape_cast %35 : vector<1x1x128xf32> to vector<1x128xf32>
    %37 = vector.broadcast %36 : vector<1x128xf32> to vector<16x128xf32>
    %38 = arith.addf %34, %37 : vector<16x128xf32>
    %cst_30 = arith.constant 0.000000e+00 : f32
    %39 = vector.broadcast %cst_30 : f32 to vector<16x128xf32>
    %40 = arith.maximumf %38, %39 : vector<16x128xf32>
    %41 = arith.truncf %40 : vector<16x128xf32> to vector<16x128xbf16>
    %c0_31 = arith.constant 0 : index
    %c0_32 = arith.constant 0 : index
    %c0_33 = arith.constant 0 : index
    %42 = vector.load %arg13[%c0_31, %c0_32, %c0_33] : memref<1x128x128xbf16, #tpu.memory_space<vmem>>, vector<1x128x128xbf16>
    %43 = vector.shape_cast %42 : vector<1x128x128xbf16> to vector<128x128xbf16>
    %cst_34 = arith.constant dense<0.000000e+00> : vector<16x128xf32>
    %44 = tpu.matmul %41, %43, %cst_34 {dimension_numbers = #tpu.dot_dimension_numbers<[1], [0], [0], [1], [0, 0, 1, 1], [], []>} : vector<16x128xbf16>, vector<128x128xbf16>, vector<16x128xf32> -> vector<16x128xf32>
    %c0_35 = arith.constant 0 : index
    %c0_36 = arith.constant 0 : index
    %c0_37 = arith.constant 0 : index
    %45 = vector.load %arg14[%c0_35, %c0_36, %c0_37] : memref<1x1x128xf32, #tpu.memory_space<vmem>>, vector<1x1x128xf32>
    %46 = vector.shape_cast %45 : vector<1x1x128xf32> to vector<1x128xf32>
    %47 = vector.broadcast %46 : vector<1x128xf32> to vector<16x128xf32>
    %48 = arith.addf %44, %47 : vector<16x128xf32>
    %49 = arith.extui %0 : i1 to i32
    %c0_i32_38 = arith.constant 0 : i32
    %50 = arith.cmpi ne, %49, %c0_i32_38 : i32
    scf.if %50 {
      %c0_41 = arith.constant 0 : index
      %c0_42 = arith.constant 0 : index
      %54 = vector.load %arg19[%c0_41, %c0_42] : memref<16x128xf32, #tpu.memory_space<vmem>>, vector<16x128xf32>
      tpu.vector_store %arg19[%c0_41, %c0_42], %48 {strides = array<i32>} : memref<16x128xf32, #tpu.memory_space<vmem>>, vector<16x128xf32>,
    } else {
    }
    %c2_i32_39 = arith.constant 2 : i32
    %51 = arith.cmpi slt, %arg0, %c2_i32_39 : i32
    %52 = arith.extui %51 : i1 to i32
    %c0_i32_40 = arith.constant 0 : i32
    %53 = arith.cmpi ne, %52, %c0_i32_40 : i32
    scf.if %53 {
      %cst_41 = arith.constant 0.000000e+00 : f32
      %54 = vector.broadcast %cst_41 : f32 to vector<16x128xf32>
      %55 = arith.maximumf %48, %54 : vector<16x128xf32>
      %c0_42 = arith.constant 0 : index
      %c0_43 = arith.constant 0 : index
      %56 = vector.load %arg19[%c0_42, %c0_43] : memref<16x128xf32, #tpu.memory_space<vmem>>, vector<16x128xf32>
      tpu.vector_store %arg19[%c0_42, %c0_43], %55 {strides = array<i32>} : memref<16x128xf32, #tpu.memory_space<vmem>>, vector<16x128xf32>,
      %c0_44 = arith.constant 0 : index
      %c0_45 = arith.constant 0 : index
      %57 = vector.load %arg7[%c0_44, %c0_45] : memref<2x16xbf16, #tpu.memory_space<vmem>>, vector<2x16xbf16>
      %cst_46 = arith.constant dense<0.000000e+00> : vector<2x128xf32>
      %58 = tpu.matmul %57, %6, %cst_46 {dimension_numbers = #tpu.dot_dimension_numbers<[1], [0], [0], [1], [0, 0, 1, 1], [], []>} : vector<2x16xbf16>, vector<16x128xbf16>, vector<2x128xf32> -> vector<2x128xf32>
      %c0_47 = arith.constant 0 : index
      %c0_48 = arith.constant 0 : index
      %59 = vector.load %arg8[%c0_47, %c0_48] : memref<2x1xf32, #tpu.memory_space<vmem>>, vector<2x1xf32>
      %cst_49 = arith.constant 1.000000e+00 : f32
      %60 = vector.broadcast %cst_49 : f32 to vector<2x1xf32>
      %61 = arith.addf %59, %60 : vector<2x1xf32>
      %62 = vector.broadcast %61 : vector<2x1xf32> to vector<2x128xf32>
      %63 = arith.mulf %62, %5 : vector<2x128xf32>
      %64 = arith.addf %58, %63 : vector<2x128xf32>
      %65 = arith.truncf %64 : vector<2x128xf32> to vector<2x128xbf16>
      %c0_50 = arith.constant 0 : index
      %c0_51 = arith.constant 0 : index
      %c0_52 = arith.constant 0 : index
      %66 = vector.load %arg15[%c0_50, %c0_51, %c0_52] : memref<1x128x128xbf16, #tpu.memory_space<vmem>>, vector<1x128x128xbf16>
      %67 = vector.shape_cast %66 : vector<1x128x128xbf16> to vector<128x128xbf16>
      %cst_53 = arith.constant dense<0.000000e+00> : vector<2x128xf32>
      %68 = tpu.matmul %65, %67, %cst_53 {dimension_numbers = #tpu.dot_dimension_numbers<[1], [0], [0], [1], [0, 0, 1, 1], [], []>} : vector<2x128xbf16>, vector<128x128xbf16>, vector<2x128xf32> -> vector<2x128xf32>
      %c0_54 = arith.constant 0 : index
      %c0_55 = arith.constant 0 : index
      %c0_56 = arith.constant 0 : index
      %69 = vector.load %arg16[%c0_54, %c0_55, %c0_56] : memref<1x1x128xf32, #tpu.memory_space<vmem>>, vector<1x1x128xf32>
      %70 = vector.shape_cast %69 : vector<1x1x128xf32> to vector<1x128xf32>
      %71 = vector.broadcast %70 : vector<1x128xf32> to vector<2x128xf32>
      %72 = arith.addf %68, %71 : vector<2x128xf32>
      %cst_57 = arith.constant 0.000000e+00 : f32
      %73 = vector.broadcast %cst_57 : f32 to vector<2x128xf32>
      %74 = arith.maximumf %72, %73 : vector<2x128xf32>
      %75 = arith.truncf %74 : vector<2x128xf32> to vector<2x128xbf16>
      %c0_58 = arith.constant 0 : index
      %c0_59 = arith.constant 0 : index
      %c0_60 = arith.constant 0 : index
      %76 = vector.load %arg17[%c0_58, %c0_59, %c0_60] : memref<1x128x128xbf16, #tpu.memory_space<vmem>>, vector<1x128x128xbf16>
      %77 = vector.shape_cast %76 : vector<1x128x128xbf16> to vector<128x128xbf16>
      %cst_61 = arith.constant dense<0.000000e+00> : vector<2x128xf32>
      %78 = tpu.matmul %75, %77, %cst_61 {dimension_numbers = #tpu.dot_dimension_numbers<[1], [0], [0], [1], [0, 0, 1, 1], [], []>} : vector<2x128xbf16>, vector<128x128xbf16>, vector<2x128xf32> -> vector<2x128xf32>
      %c0_62 = arith.constant 0 : index
      %c0_63 = arith.constant 0 : index
      %c0_64 = arith.constant 0 : index
      %79 = vector.load %arg18[%c0_62, %c0_63, %c0_64] : memref<1x1x128xf32, #tpu.memory_space<vmem>>, vector<1x1x128xf32>
      %80 = vector.shape_cast %79 : vector<1x1x128xf32> to vector<1x128xf32>
      %81 = vector.broadcast %80 : vector<1x128xf32> to vector<2x128xf32>
      %82 = arith.addf %78, %81 : vector<2x128xf32>
      %cst_65 = arith.constant 0.000000e+00 : f32
      %83 = vector.broadcast %cst_65 : f32 to vector<2x128xf32>
      %84 = arith.maximumf %82, %83 : vector<2x128xf32>
      %c0_66 = arith.constant 0 : index
      %c0_67 = arith.constant 0 : index
      %85 = vector.load %arg20[%c0_66, %c0_67] : memref<2x128xf32, #tpu.memory_space<vmem>>, vector<2x128xf32>
      tpu.vector_store %arg20[%c0_66, %c0_67], %84 {strides = array<i32>} : memref<2x128xf32, #tpu.memory_space<vmem>>, vector<2x128xf32>,
    } else {
    }
    return
  }
  func.func @transform_0(%arg0: i32) -> (i32, i32) {
    %c0_i32 = arith.constant 0 : i32
    %c0_i32_0 = arith.constant 0 : i32
    %c0_i32_1 = arith.constant 0 : i32
    return %c0_i32, %c0_i32_0 : i32, i32
  }
  func.func @transform_1(%arg0: i32) -> (i32, i32) {
    %c0_i32 = arith.constant 0 : i32
    %c0_i32_0 = arith.constant 0 : i32
    %c0_i32_1 = arith.constant 0 : i32
    return %c0_i32, %c0_i32_0 : i32, i32
  }
  func.func @transform_2(%arg0: i32) -> (i32, i32) {
    %c0_i32 = arith.constant 0 : i32
    %c0_i32_0 = arith.constant 0 : i32
    %c0_i32_1 = arith.constant 0 : i32
    return %c0_i32, %c0_i32_0 : i32, i32
  }
  func.func @transform_3(%arg0: i32) -> (i32, i32) {
    %c0_i32 = arith.constant 0 : i32
    %c0_i32_0 = arith.constant 0 : i32
    %c0_i32_1 = arith.constant 0 : i32
    return %c0_i32, %c0_i32_0 : i32, i32
  }
  func.func @transform_4(%arg0: i32) -> (i32, i32) {
    %c0_i32 = arith.constant 0 : i32
    %c0_i32_0 = arith.constant 0 : i32
    %c0_i32_1 = arith.constant 0 : i32
    return %c0_i32, %c0_i32_0 : i32, i32
  }
  func.func @transform_5(%arg0: i32) -> (i32, i32) {
    %c0_i32 = arith.constant 0 : i32
    %c0_i32_0 = arith.constant 0 : i32
    %c0_i32_1 = arith.constant 0 : i32
    return %c0_i32, %c0_i32_0 : i32, i32
  }
  func.func @transform_6(%arg0: i32) -> (i32, i32) {
    %c0_i32 = arith.constant 0 : i32
    %c0_i32_0 = arith.constant 0 : i32
    %c0_i32_1 = arith.constant 0 : i32
    return %c0_i32, %c0_i32_0 : i32, i32
  }
  func.func @transform_7(%arg0: i32) -> (i32, i32) {
    %c0_i32 = arith.constant 0 : i32
    %c0_i32_0 = arith.constant 0 : i32
    %c0_i32_1 = arith.constant 0 : i32
    return %c0_i32, %c0_i32_0 : i32, i32
  }
  func.func @transform_8(%arg0: i32) -> (i32, i32, i32) {
    %c0_i32 = arith.constant 0 : i32
    %c0_i32_0 = arith.constant 0 : i32
    %c0_i32_1 = arith.constant 0 : i32
    return %arg0, %c0_i32, %c0_i32_0 : i32, i32, i32
  }
  func.func @transform_9(%arg0: i32) -> (i32, i32, i32) {
    %c0_i32 = arith.constant 0 : i32
    %c0_i32_0 = arith.constant 0 : i32
    %c0_i32_1 = arith.constant 0 : i32
    return %arg0, %c0_i32, %c0_i32_0 : i32, i32, i32
  }
  func.func @transform_10(%arg0: i32) -> (i32, i32, i32) {
    %c0_i32 = arith.constant 0 : i32
    %c0_i32_0 = arith.constant 0 : i32
    %c0_i32_1 = arith.constant 0 : i32
    return %arg0, %c0_i32, %c0_i32_0 : i32, i32, i32
  }
  func.func @transform_11(%arg0: i32) -> (i32, i32, i32) {
    %c0_i32 = arith.constant 0 : i32
    %c0_i32_0 = arith.constant 0 : i32
    %c0_i32_1 = arith.constant 0 : i32
    return %arg0, %c0_i32, %c0_i32_0 : i32, i32, i32
  }
  func.func @transform_12(%arg0: i32) -> (i32, i32, i32) {
    %c0_i32 = arith.constant 0 : i32
    %c0_i32_0 = arith.constant 0 : i32
    %c0_i32_1 = arith.constant 0 : i32
    return %arg0, %c0_i32, %c0_i32_0 : i32, i32, i32
  }
  func.func @transform_13(%arg0: i32) -> (i32, i32, i32) {
    %c0_i32 = arith.constant 0 : i32
    %c0_i32_0 = arith.constant 0 : i32
    %c0_i32_1 = arith.constant 0 : i32
    return %arg0, %c0_i32, %c0_i32_0 : i32, i32, i32
  }
  func.func @transform_14(%arg0: i32) -> (i32, i32, i32) {
    %c0_i32 = arith.constant 0 : i32
    %c0_i32_0 = arith.constant 0 : i32
    %c0_i32_1 = arith.constant 0 : i32
    return %arg0, %c0_i32, %c0_i32_0 : i32, i32, i32
  }
  func.func @transform_15(%arg0: i32) -> (i32, i32, i32) {
    %c0_i32 = arith.constant 0 : i32
    %c0_i32_0 = arith.constant 0 : i32
    %c0_i32_1 = arith.constant 0 : i32
    return %arg0, %c0_i32, %c0_i32_0 : i32, i32, i32
  }
  func.func @transform_16(%arg0: i32) -> (i32, i32, i32) {
    %c0_i32 = arith.constant 0 : i32
    %c0_i32_0 = arith.constant 0 : i32
    %c0_i32_1 = arith.constant 0 : i32
    return %arg0, %c0_i32, %c0_i32_0 : i32, i32, i32
  }
  func.func @transform_17(%arg0: i32) -> (i32, i32, i32) {
    %c0_i32 = arith.constant 0 : i32
    %c0_i32_0 = arith.constant 0 : i32
    %c0_i32_1 = arith.constant 0 : i32
    return %arg0, %c0_i32, %c0_i32_0 : i32, i32, i32
  }
  func.func @transform_18(%arg0: i32) -> (i32, i32) {
    %c0_i32 = arith.constant 0 : i32
    %c0_i32_0 = arith.constant 0 : i32
    %c0_i32_1 = arith.constant 0 : i32
    return %c0_i32, %c0_i32_0 : i32, i32
  }
}

</mosaic_0001>

<bundles_post_ra>
// kernel: forward_pallas.1
= control target key start
LH: loop header
LB: loop body
LE: loop exit
PB: predicated region body
PF: predicated region fallthrough
CT: control target
= control target key end

     0   :  { %s2469_s0 = inlined_call_operand.vmem [shape: f32[16,128], index: 0, kind: input, shape index: {}]   ;;  %s2470_s1 = inlined_call_operand.vmem [shape: f32[2,128], index: 1, kind: input, shape index: {}]   ;;  %s2471_s2 = inlined_call_operand.vmem [shape: bf16[16,2], index: 2, kind: input, shape index: {}]   ;;  %s2472_s3 = inlined_call_operand.vmem [shape: bf16[48,16], index: 3, kind: input, shape index: {}]   ;;  %s2473_s4 = inlined_call_operand.vmem [shape: bf16[48,2], index: 4, kind: input, shape index: {}]   ;;  %s2474_s5 = inlined_call_operand.vmem [shape: bf16[16,48], index: 5, kind: input, shape index: {}]   ;;  %s2475_s6 = inlined_call_operand.vmem [shape: bf16[2,16], index: 6, kind: input, shape index: {}]   ;;  %s2476_s7 = inlined_call_operand.vmem [shape: f32[2,1], index: 7, kind: input, shape index: {}]   ;;  %s2477_s8 = inlined_call_operand.vmem [shape: f32[3,1,1], index: 8, kind: input, shape index: {}]   ;;  %s2478_s9 = inlined_call_operand.vmem [shape: f32[3,48,128], index: 9, kind: input, shape index: {}]   ;;  %s2479_s10 = inlined_call_operand.vmem [shape: bf16[3,128,128], index: 10, kind: input, shape index: {}]   ;;  %s2480_s11 = inlined_call_operand.vmem [shape: f32[3,1,128], index: 11, kind: input, shape index: {}]   ;;  %s2481_s12 = inlined_call_operand.vmem [shape: bf16[3,128,128], index: 12, kind: input, shape index: {}]   ;;  %s2482_s13 = inlined_call_operand.vmem [shape: f32[3,1,128], index: 13, kind: input, shape index: {}]   ;;  %s2483_s14 = inlined_call_operand.vmem [shape: bf16[3,128,128], index: 14, kind: input, shape index: {}]   ;;  %s2484_s15 = inlined_call_operand.vmem [shape: f32[3,1,128], index: 15, kind: input, shape index: {}]   ;;  %s2485_s16 = inlined_call_operand.vmem [shape: bf16[3,128,128], index: 16, kind: input, shape index: {}]   ;;  %s2486_s17 = inlined_call_operand.vmem [shape: f32[3,1,128], index: 17, kind: input, shape index: {}]   ;;  %s2487_s18 = inlined_call_operand.hbm [shape: f32[16,128], index: 18, kind: output, shape index: {}]  }
   0x1   :  { %2491 = sst [smem:[#allocation7_spill]] %s2469_s0 }
   0x2   :  { %2492 = sst [smem:[#allocation8_spill]] %s2470_s1 }
   0x3   :  { %2493 = sst [smem:[#allocation9_spill]] %s2471_s2 }
   0x4   :  { %2494 = sst [smem:[#allocation10_spill]] %s2475_s6 }
   0x5   :  { %2495 = sst [smem:[#allocation11_spill]] %s2476_s7 }
   0x6   :  { %2496 = sst [smem:[#allocation12_spill]] %s2478_s9 }
   0x7   :  { %2497 = sst [smem:[#allocation13_spill]] %s2479_s10 }
   0x8   :  { %2498 = sst [smem:[#allocation14_spill]] %s2481_s12 }
   0x9   :  { %2499 = sst [smem:[#allocation15_spill]] %s2487_s18 }
   0xa   :  { %23 = vsyncpa [#allocation4], 0  ;;  %s2180_s27 = smov 0  }
   0xb LB: > { %2500 = sst [smem:[#allocation6_spill]] %s2074_s27  ;;  %s2186_s28 = sadd.s32 4294967295, %s2074_s27   ;;  %s2074_s27 = sphi %s2180_s27, %s29_s27  }
   0xc   : > { %p1714_p0 = scmp.ge.s32.totalorder %s2074_s27, 1  ;;  %p588_p1 = scmp.lt.s32.totalorder %s2074_s27, 4 }
   0xe   : > { %p589_p2 = pnand %p1714_p0, %p588_p1 }
   0xf   : > { %p672_p3 = scmp.lt.s32.totalorder (!%p589_p2), %s2186_s28, 2  ;;  %s2501_s9 = sld [smem:[#allocation12_spill]] (!%p589_p2) }
  0x10   : > { %592 = sbr.rel (%p589_p2) target bundleno = 1653 (0x675), region = 92  ;;  %s2502_s10 = sld [smem:[#allocation13_spill]] (!%p589_p2) }
  0x11   : > { %s2503_s12 = sld [smem:[#allocation14_spill]] (!%p589_p2)  ;;  %p1724_p4 = scmp.ne.s32.totalorder (!%p589_p2), %s2186_s28, 0 }
  0x17   : > { %s2192_s29 = scalar_select %p672_p3, %s2186_s28, 2 }
  0x18   : > { %717 = sbr.rel (%p1724_p4) target bundleno = 37 (0x25), region = 96  ;;  %s2504_s2 = sld [smem:[#allocation7_spill]] (!%p1724_p4) }
  0x19   : > { %s1972_s1 = smul.u32 48, %s2192_s29  ;;  %s1784_s20 = sshll.u32 %s2192_s29, 6 }
  0x1a   : > { %s2212_s0 = scalar_lea.vmem %s2502_s10, %s1784_s20  ;;  %s2217_s19 = scalar_lea.vmem %s2503_s12, %s1784_s20 }
  0x1b   : > { %s2207_s25 = scalar_lea.vmem %s2501_s9, %s1972_s1  ;;  %s2226_s23 = scalar_lea.vmem %s2483_s14, %s1784_s20 }
  0x1c   : > { %s703_s26 = scalar_lea.vmem %s2484_s15, %s2192_s29  ;;  %s2235_s10 = scalar_lea.vmem %s2485_s16, %s1784_s20 }
  0x1d   : > { %s711_s12 = scalar_lea.vmem %s2486_s17, %s2192_s29  ;;  %s2505_s9 = sld [smem:[#allocation8_spill]] (!%p1724_p4) }
  0x1e   : > { %v718_v0 = vld [vmem:[%s2504_s2] sm:$0xff] (!%p1724_p4)  ;;  %v719_v1 = vld [vmem:[%s2504_s2 + $0x8] sm:$0xff] (!%p1724_p4) }
  0x1f   : > { %720 = vst [vmem:[#allocation3] sm:$0xff] %v718_v0  ;;  %721 = vst [vmem:[#allocation3 + $0x8] sm:$0xff] %v719_v1 }
  0x23   : > { %v722_v2 = vld [vmem:[%s2505_s9] sm:$0x3] }
  0x24   : > { %723 = vst [vmem:[#allocation2] sm:$0x3] %v722_v2 }
  0x25 PF: > { %vm740_vm0 = vcmask 1040384   ;;  %v2076_v4 = vmov 0.0   ;;  %vm2077_vm1 = vmmov 0   ;;  %v1038_v6 = vlaneseq  ;;  %s2506_s30 = sld [smem:[#allocation9_spill]]  ;;  %v2000_v9 = vld [vmem:[%s2473_s4 + $0x8] sm:$0xff]   ;;  %s2507_s22 = scalar_lea.vmem %s2477_s8, %s2192_s29  ;;  %v1998_v16 = vld [vmem:[%s2473_s4] sm:$0xff]  }
  0x26   : > { %1840 = vmatprep.subr.bf16.mxu0 %v2076_v4  ;;  %1842 = vmatprep.mubr.msk.bf16.mxu0 %vm2077_vm1, %v2076_v4  ;;  %vm736_vm2 = vcmask 15360   ;;  %v2078_v10 = vmov 0   ;;  %v1035_v15 = vld [vmem:[%s2507_s22] sm:$0x1]  ;;  %v2002_v17 = vld [vmem:[%s2473_s4 + $0x10] sm:$0xff]   ;;  %vm895_vm3 = vcmask 130048   ;;  %s2508_s24 = scalar_lea.vmem %s2480_s11, %s2192_s29 }
  0x27   : > { %1970 = vmatprep.subr.bf16.mxu1 %v2076_v4  ;;  %1852 = vmatprep.mubr.msk.bf16.mxu1 %vm2077_vm1, %v2076_v4  ;;  %v1039_v11 = vshrl.u32 %v1038_v6, 7  ;;  %v1036_v18 = vadd.f32 1.0, %v1035_v15  ;;  %v1999_v21 = vld [vmem:[%s2472_s3] sm:$0xff]   ;;  %v2001_v22 = vld [vmem:[%s2472_s3 + $0x8] sm:$0xff]   ;;  %v2003_v23 = vld [vmem:[%s2472_s3 + $0x10] sm:$0xff]   ;;  %vm990_vm4 = vcmask 392192  }
  0x28   : > { %1996 = vset.pattern.permute.xlu0 %v2078_v10  ;;  %v2005_v24 = vld [vmem:[%s2212_s0] sm:$0xff]   ;;  %v2006_v25 = vld [vmem:[%s2212_s0 + $0x8] sm:$0xff]   ;;  %v2007_v26 = vld [vmem:[%s2212_s0 + $0x10] sm:$0xff]   ;;  %p1759_p5 = scmp.ne.s32.totalorder %s2186_s28, 2 }
  0x29   : > { %v1040_v13 = vsub.s32 0, %v1039_v11  ;;  %v2008_v27 = vld [vmem:[%s2212_s0 + $0x18] sm:$0xff]   ;;  %v2009_v28 = vld [vmem:[%s2212_s0 + $0x20] sm:$0xff]   ;;  %v2010_v29 = vld [vmem:[%s2212_s0 + $0x28] sm:$0xff]  }
  0x2a   : > { %v962_v47 = vld [vmem:[%s2207_s25] sm:$0xff]  ;;  %v963_v51 = vld [vmem:[%s2207_s25 + $0x8] sm:$0xff]  ;;  %v964_v59 = vld [vmem:[%s2207_s25 + $0x10] sm:$0xff] }
  0x2b   : > { %v2251_v3 = vld [vmem:[#allocation2] sm:$0x3]  ;;  %v1041_v19 = vrot.slane %v1036_v18, %v1040_v13  ;;  %v965_v0 = vld [vmem:[%s2207_s25 + $0x18] sm:$0xff] }
  0x2c   : > { %v728_v5 = vpack.c.bf16 %v2251_v3, %v2251_v3  ;;  %v1997_v8 = vld [vmem:[%s2506_s30] sm:$0xff]   ;;  %v2275_v14 = vld [vmem:[#allocation3 + $0x8] sm:$0xff] }
  0x2d   : > { %v2270_v12 = vld [vmem:[#allocation3] sm:$0xff]  ;;  %1043 = vperm.xlu0 %1996, %v1041_v19  }
  0x2e   : > { %v742_v7 = vsel %vm740_vm0, %v728_v5, 0  ;;  %v2293_v20 = vpack.c.bf16 %v2275_v14, %v2270_v12  ;;  %v966_v10 = vld [vmem:[%s2207_s25 + $0x20] sm:$0xff] }
  0x2f   : > { %1841 = vmatpush3.bf16.msra.mxu0 %v742_v7  ;;  %1971 = vmatpush3.bf16.msra.mxu1 %v742_v7 }
  0x30   : > { %1846 = vmatprep.subr.bf16.mxu0 %v2076_v4  ;;  %1874 = vmatprep.subr.bf16.mxu1 %v2076_v4 }
  0x32   : > { %1843 = vmatmul.mubr.msk.bf16.vlgmr.msra.gmra.mrb[0].mxu0 %vm736_vm2, %v1997_v8  ;;  %1853 = vmatmul.mubr.msk.bf16.vlgmr.msra.gmra.mrb[0].mxu1 %vm736_vm2, %v2000_v9 }
  0x33   : > { %1847 = vmatpush3.bf16.msra.mxu0 %v742_v7  ;;  %1848 = vmatprep.mubr.msk.bf16.mxu0 %vm2077_vm1, %v2076_v4 }
  0x34   : > { %1860 = vmatprep.subr.bf16.mxu0 %v2076_v4  ;;  %1856 = vmatprep.mubr.msk.bf16.mxu1 %vm2077_vm1, %v2076_v4 }
  0x3a   : > { %1849 = vmatmul.mubr.msk.bf16.vlgmr.msra.gmra.mrb[4].mxu0 %vm736_vm2, %v1998_v16  ;;  %1857 = vmatmul.mubr.msk.bf16.gmra.mrb[4].mxu1 %vm736_vm2, %v2002_v17  ;;  %v967_v17 = vld [vmem:[%s2207_s25 + $0x28] sm:$0xff] }
  0x3b   : > { %1861 = vmatpush3.bf16.msra.mxu0 %v2293_v20  ;;  %1862 = vmatprep.mubr.msk.bf16.mxu0 %vm2077_vm1, %v2076_v4 }
  0x3c   : > { %1880 = vmatprep.mubr.msk.bf16.mxu1 %vm2077_vm1, %v2076_v4  ;;  %1884 = vmatprep.subr.bf16.mxu0 %v2076_v4 }
  0x42   : > { %1863 = vmatmul.mubr.msk.bf16.vlgmr.msra.gmra.mrb[8].mxu0 %vm895_vm3, %v1999_v21 }
  0x43   : > { %1866 = vmatprep.mubr.msk.bf16.mxu0 %vm2077_vm1, %v2076_v4  ;;  %1885 = vmatpush3.bf16.msra.mxu0 %v2005_v24 }
  0x44   : > { %1886 = vmatprep.subr.bf16.mxu0 %v2076_v4 }
  0x47   : > { %1887 = vmatpush3.bf16.msra.mxu0 %v2006_v25 }
  0x48   : > { %1888 = vmatprep.subr.bf16.mxu0 %v2076_v4 }
  0x4a   : > { %1867 = vmatmul.mubr.msk.bf16.gmra.mrb[12].mxu0 %vm895_vm3, %v2001_v22 }
  0x4b   : > { %1870 = vmatprep.mubr.msk.bf16.mxu0 %vm2077_vm1, %v2076_v4  ;;  %1889 = vmatpush3.bf16.msra.mxu0 %v2007_v26  ;;  %v2004_v26 = vld [vmem:[%s2474_s5] sm:$0xff]  }
  0x4c   : > { %1890 = vmatprep.subr.bf16.mxu0 %v2076_v4 }
  0x4f   : > { %1891 = vmatpush3.bf16.msra.mxu0 %v2008_v27  ;;  %v2011_v27 = vld [vmem:[%s2212_s0 + $0x30] sm:$0xff]  }
  0x50   : > { %1892 = vmatprep.subr.bf16.mxu0 %v2076_v4 }
  0x52   : > { %1871 = vmatmul.mubr.msk.bf16.gmra.mrb[16].mxu0 %vm895_vm3, %v2003_v23 }
  0x53   : > { %1900 = vmatprep.mubr.msk.bf16.mxu0 %vm2077_vm1, %v2076_v4  ;;  %1893 = vmatpush3.bf16.msra.mxu0 %v2009_v28  ;;  %v2012_v28 = vld [vmem:[%s2212_s0 + $0x38] sm:$0xff]  }
  0x54   : > { %1894 = vmatprep.subr.bf16.mxu0 %v2076_v4 }
  0x57   : > { %1895 = vmatpush3.bf16.msra.mxu0 %v2010_v29  ;;  %v2013_v29 = vld [vmem:[%s2217_s19] sm:$0xff]  }
  0x58   : > { %1896 = vmatprep.subr.bf16.mxu0 %v2076_v4 }
  0x5b   : > { %1897 = vmatpush3.bf16.msra.mxu0 %v2011_v27 }
  0x5c   : > { %1898 = vmatprep.subr.bf16.mxu0 %v2076_v4 }
  0x5f   : > { %1899 = vmatpush3.bf16.msra.mxu0 %v2012_v28 }
 0x105   : > { %v2333_v30 = vpop.f32.mrb[0].mxu0  ;;  %v865_v31 = vpop.f32.mrb[0].mxu1 }
 0x106   : > { %v1844_v32 = vpop.f32.mrb[1].mxu0  ;;  %v1854_v33 = vpop.f32.mrb[1].mxu1 }
 0x107   : > { %v2335_v34 = vpop.f32.mrb[2].mxu0  ;;  %v868_v35 = vpop.f32.mrb[2].mxu1  ;;  %v2015_v32 = vld [vmem:[%s2217_s19 + $0x10] sm:$0xff]   ;;  %v2016_v33 = vld [vmem:[%s2217_s19 + $0x18] sm:$0xff]  }
 0x108   : > { %v1845_v36 = vpop.f32.mrb[3].mxu0  ;;  %v1855_v37 = vpop.f32.mrb[3].mxu1 }
 0x109   : > { %v2018_v36 = vld [vmem:[%s2217_s19 + $0x28] sm:$0xff]   ;;  %v785_v37 = vadd.f32 %v2333_v30, %v2270_v12  ;;  %v2020_v12 = vld [vmem:[%s2217_s19 + $0x38] sm:$0xff]  }
 0x10d   : > { %v857_v38 = vpop.f32.mrb[4].mxu0  ;;  %v873_v39 = vpop.f32.mrb[4].mxu1 }
 0x10e   : > { %v1850_v40 = vpop.f32.mrb[5].mxu0  ;;  %v1858_v41 = vpop.f32.mrb[5].mxu1 }
 0x10f   : > { %v860_v42 = vpop.f32.mrb[6].mxu0  ;;  %v876_v43 = vpop.f32.mrb[6].mxu1 }
 0x110   : > { %v1851_v44 = vpop.f32.mrb[7].mxu0  ;;  %v1859_v45 = vpop.f32.mrb[7].mxu1 }
 0x115   : > { %v939_v46 = vpop.f32.mrb[8].mxu0 }
 0x116   : > { %v940_v48 = vadd.f32 %v939_v46, %v857_v38  ;;  %v1864_v49 = vpop.f32.mrb[9].mxu0  ;;  %v1044_v38 = vpop.permute.xlu0 %1043 }
 0x117   : > { %v942_v50 = vpop.f32.mrb[10].mxu0  ;;  %v1046_v40 = vmul.f32 %v1044_v38, %v785_v37  ;;  %v2019_v49 = vld [vmem:[%s2217_s19 + $0x30] sm:$0xff]  }
 0x118   : > { %v968_v52 = vadd.f32 %v962_v47, %v940_v48  ;;  %v943_v53 = vadd.f32 %v942_v50, %v860_v42  ;;  %v1865_v54 = vpop.f32.mrb[11].mxu0 }
 0x11a   : > { %v969_v55 = vadd.f32 %v963_v51, %v943_v53  ;;  %v974_v56 = vmax.f32 %v968_v52, 0.0 }
 0x11c   : > { %v975_v57 = vmax.f32 %v969_v55, 0.0 }
 0x11d   : > { %v947_v58 = vpop.f32.mrb[12].mxu0 }
 0x11e   : > { %v982_v60 = vpack.c.bf16 %v975_v57, %v974_v56  ;;  %v948_v61 = vadd.f32 %v947_v58, %v865_v31  ;;  %v1868_v62 = vpop.f32.mrb[13].mxu0  ;;  %v2014_v31 = vld [vmem:[%s2217_s19 + $0x8] sm:$0xff]  }
 0x11f   : > { %v950_v63 = vpop.f32.mrb[14].mxu0 }
 0x120   : > { %v970_v1 = vadd.f32 %v964_v59, %v948_v61  ;;  %v951_v2 = vadd.f32 %v950_v63, %v868_v35  ;;  %v1869_v5 = vpop.f32.mrb[15].mxu0  ;;  %1875 = vmatpush3.bf16.msra.mxu1 %v982_v60  ;;  %v2017_v35 = vld [vmem:[%s2217_s19 + $0x20] sm:$0xff]   ;;  %s2509_s19 = scalar_lea.vmem %s2482_s13, %s2192_s29 }
 0x121   : > { %1876 = vmatprep.subr.bf16.mxu1 %v2076_v4 }
 0x122   : > { %v971_v6 = vadd.f32 %v965_v0, %v951_v2  ;;  %v976_v7 = vmax.f32 %v970_v1, 0.0 }
 0x124   : > { %v977_v8 = vmax.f32 %v971_v6, 0.0 }
 0x125   : > { %v955_v9 = vpop.f32.mrb[16].mxu0 }
 0x126   : > { %v983_v11 = vpack.c.bf16 %v977_v8, %v976_v7  ;;  %v956_v13 = vadd.f32 %v955_v9, %v873_v39  ;;  %v1872_v15 = vpop.f32.mrb[17].mxu0  ;;  %v786_v39 = vadd.f32 %v2335_v34, %v2275_v14  ;;  %v1741_v14 = vld [vmem:[%s2508_s24] ss:$0 sm:$0xff] }
 0x127   : > { %v958_v16 = vpop.f32.mrb[18].mxu0 }
 0x128   : > { %v972_v18 = vadd.f32 %v966_v10, %v956_v13  ;;  %v959_v19 = vadd.f32 %v958_v16, %v876_v43  ;;  %v1873_v21 = vpop.f32.mrb[19].mxu0  ;;  %1877 = vmatpush3.bf16.msra.mxu1 %v983_v11  ;;  %v1047_v44 = vmul.f32 %v1044_v38, %v786_v39 }
 0x129   : > { %1878 = vmatprep.subr.bf16.mxu1 %v2076_v4 }
 0x12a   : > { %v973_v22 = vadd.f32 %v967_v17, %v959_v19  ;;  %v978_v23 = vmax.f32 %v972_v18, 0.0 }
 0x12c   : > { %v979_v24 = vmax.f32 %v973_v22, 0.0 }
 0x12e   : > { %v984_v25 = vpack.c.bf16 %v979_v24, %v978_v23 }
 0x130   : > { %1879 = vmatpush3.bf16.msra.mxu1 %v984_v25 }
 0x131   : > { %1904 = vmatprep.subr.bf16.mxu1 %v2076_v4 }
 0x133   : > { %1881 = vmatmul.mubr.msk.bf16.vlgmr.msra.gmra.mrb[8].mxu1 %vm990_vm4, %v2004_v26 }
 0x134   : > { %1920 = vmatprep.mubr.msk.bf16.mxu1 %vm2077_vm1, %v2076_v4  ;;  %1905 = vmatpush3.bf16.msra.mxu1 %v2013_v29 }
 0x135   : > { %1906 = vmatprep.subr.bf16.mxu1 %v2076_v4 }
 0x138   : > { %1907 = vmatpush3.bf16.msra.mxu1 %v2014_v31 }
 0x139   : > { %1908 = vmatprep.subr.bf16.mxu1 %v2076_v4 }
 0x13c   : > { %1909 = vmatpush3.bf16.msra.mxu1 %v2015_v32 }
 0x13d   : > { %1910 = vmatprep.subr.bf16.mxu1 %v2076_v4 }
 0x140   : > { %1911 = vmatpush3.bf16.msra.mxu1 %v2016_v33 }
 0x141   : > { %1912 = vmatprep.subr.bf16.mxu1 %v2076_v4 }
 0x144   : > { %1913 = vmatpush3.bf16.msra.mxu1 %v2017_v35 }
 0x145   : > { %1914 = vmatprep.subr.bf16.mxu1 %v2076_v4 }
 0x148   : > { %1915 = vmatpush3.bf16.msra.mxu1 %v2018_v36 }
 0x149   : > { %1916 = vmatprep.subr.bf16.mxu1 %v2076_v4 }
 0x14c   : > { %1917 = vmatpush3.bf16.msra.mxu1 %v2019_v49 }
 0x14d   : > { %1918 = vmatprep.subr.bf16.mxu1 %v2076_v4  ;;  %v1750_v4 = vld [vmem:[%s2509_s19] ss:$0 sm:$0xff] }
 0x150   : > { %1919 = vmatpush3.bf16.msra.mxu1 %v2020_v12 }
 0x206   : > { %v1028_v41 = vpop.f32.mrb[8].mxu1 }
 0x207   : > { %v1048_v42 = vadd.f32 %v1046_v40, %v1028_v41  ;;  %v1882_v43 = vpop.f32.mrb[9].mxu1 }
 0x208   : > { %v1031_v45 = vpop.f32.mrb[10].mxu1 }
 0x209   : > { %v1049_v46 = vadd.f32 %v1047_v44, %v1031_v45  ;;  %v1883_v47 = vpop.f32.mrb[11].mxu1 }
 0x20b   : > { %v1050_v48 = vpack.c.bf16 %v1049_v46, %v1048_v42 }
 0x20d   : > { %1901 = vmatmul.mubr.bf16.vlgmr.msra.gmra.mrb[20].mxu0 %v1050_v48 }
 0x2e0   : > { %v1156_v30 = vpop.f32.mrb[20].mxu0 }
 0x2e1   : > { %v1157_v34 = vadd.f32 %v1741_v14, %v1156_v30  ;;  %v1902_v50 = vpop.f32.mrb[21].mxu0 }
 0x2e2   : > { %v1159_v51 = vpop.f32.mrb[22].mxu0 }
 0x2e3   : > { %v1160_v52 = vadd.f32 %v1741_v14, %v1159_v51  ;;  %v1903_v53 = vpop.f32.mrb[23].mxu0  ;;  %v1163_v54 = vmax.f32 %v1157_v34, 0.0 }
 0x2e5   : > { %v1164_v55 = vmax.f32 %v1160_v52, 0.0 }
 0x2e7   : > { %v1165_v56 = vpack.c.bf16 %v1164_v55, %v1163_v54 }
 0x2e9   : > { %1921 = vmatmul.mubr.bf16.vlgmr.msra.gmra.mrb[12].mxu1 %v1165_v56 }
 0x3b9   : > { %1280 = sbr.rel (%p1759_p5) target bundleno = 962 (0x3c2), region = 100 }
 0x3bc   : > { %v1271_v57 = vpop.f32.mrb[12].mxu1 }
 0x3bd   : > { %v1272_v58 = vadd.f32 %v1750_v4, %v1271_v57  ;;  %v1922_v59 = vpop.f32.mrb[13].mxu1 }
 0x3be   : > { %v1274_v60 = vpop.f32.mrb[14].mxu1 }
 0x3bf   : > { %v1275_v61 = vadd.f32 %v1750_v4, %v1274_v60  ;;  %v1923_v62 = vpop.f32.mrb[15].mxu1  ;;  %1281 = vst [vmem:[#allocation3] sm:$0xff] (!%p1759_p5), %v1272_v58 }
 0x3c1   : > { %1282 = vst [vmem:[#allocation3 + $0x8] sm:$0xff] %v1275_v61 }
 0x3c2 PF: > { %p1760_p6 = scmp.ge.s32.totalorder %s2186_s28, 2 }
 0x3c3   : > { %v1287_v63 = vmax.f32 (!%p1760_p6), %v1272_v58, 0.0  ;;  %v1288_v0 = vmax.f32 (!%p1760_p6), %v1275_v61, 0.0  ;;  %s2510_s18 = sld [smem:[#allocation10_spill]] (!%p1760_p6)  ;;  %v2079_v2 = vmov (!%p1760_p6), 0.0   ;;  %vm2080_vm5 = vmmov (!%p1760_p6), 0   ;;  %s2511_s7 = sld [smem:[#allocation11_spill]] (!%p1760_p6) }
 0x3c4   : > { %1286 = sbr.rel (%p1760_p6) target bundleno = 1621 (0x655), region = 104  ;;  %1924 = vmatprep.subr.bf16.mxu0 (!%p1760_p6), %v2079_v2  ;;  %1926 = vmatprep.mubr.msk.bf16.mxu0 (!%p1760_p6), %vm2080_vm5, %v2079_v2  ;;  %v2022_v6 = vld [vmem:[%s2226_s23] sm:$0xff] (!%p1760_p6)   ;;  %v2081_v7 = vmov (!%p1760_p6), 0   ;;  %v2023_v9 = vld [vmem:[%s2226_s23 + $0x8] sm:$0xff] (!%p1760_p6)   ;;  %v2025_v10 = vld [vmem:[%s2226_s23 + $0x18] sm:$0xff] (!%p1760_p6)  }
 0x3c5   : > { %1289 = vst [vmem:[#allocation3] sm:$0xff] (!%p1760_p6), %v1287_v63  ;;  %1290 = vst [vmem:[#allocation3 + $0x8] sm:$0xff] (!%p1760_p6), %v1288_v0  ;;  %1925 = vmatpush3.bf16.msra.mxu0 (!%p1760_p6), %v2293_v20  ;;  %2021 = vset.pattern.permute.xlu0 (!%p1760_p6), %v2081_v7  ;;  %v2024_v20 = vld [vmem:[%s2226_s23 + $0x10] sm:$0xff] (!%p1760_p6)   ;;  %v2026_v11 = vld [vmem:[%s2226_s23 + $0x20] sm:$0xff] (!%p1760_p6)  }
 0x3c6   : > { %1930 = vmatprep.subr.bf16.mxu1 (!%p1760_p6), %v2079_v2  ;;  %1946 = vmatprep.mubr.msk.bf16.mxu1 (!%p1760_p6), %vm2080_vm5, %v2079_v2  ;;  %v2027_v13 = vld [vmem:[%s2226_s23 + $0x28] sm:$0xff] (!%p1760_p6)   ;;  %v2028_v15 = vld [vmem:[%s2226_s23 + $0x30] sm:$0xff] (!%p1760_p6)   ;;  %v2029_v16 = vld [vmem:[%s2226_s23 + $0x38] sm:$0xff] (!%p1760_p6)  }
 0x3c7   : > { %1931 = vmatpush3.bf16.msra.mxu1 (!%p1760_p6), %v2022_v6  ;;  %1950 = vmatprep.subr.bf16.mxu0 (!%p1760_p6), %v2079_v2  ;;  %v2030_v17 = vld [vmem:[%s2235_s10] sm:$0xff] (!%p1760_p6)   ;;  %v2031_v18 = vld [vmem:[%s2235_s10 + $0x8] sm:$0xff] (!%p1760_p6)   ;;  %v2032_v19 = vld [vmem:[%s2235_s10 + $0x10] sm:$0xff] (!%p1760_p6)  }
 0x3c8   : > { %1932 = vmatprep.subr.bf16.mxu1 (!%p1760_p6), %v2079_v2  ;;  %v2033_v21 = vld [vmem:[%s2235_s10 + $0x18] sm:$0xff] (!%p1760_p6)   ;;  %v2034_v22 = vld [vmem:[%s2235_s10 + $0x20] sm:$0xff] (!%p1760_p6)   ;;  %v2035_v23 = vld [vmem:[%s2235_s10 + $0x28] sm:$0xff] (!%p1760_p6)  }
 0x3c9   : > { %v1291_v1 = vld [vmem:[%s2510_s18] sm:$0x1] (!%p1760_p6)  ;;  %v2036_v33 = vld [vmem:[%s2235_s10 + $0x30] sm:$0xff] (!%p1760_p6)   ;;  %v2037_v35 = vld [vmem:[%s2235_s10 + $0x38] sm:$0xff] (!%p1760_p6)  }
 0x3ca   : > { %v1292_v5 = vld [vmem:[%s2511_s7] sm:$0x3] (!%p1760_p6)  ;;  %1927 = vmatmul.mubr.msk.bf16.vlgmr.msra.gmra.mrb[0].mxu0 (!%p1760_p6), %vm895_vm3, %v1291_v1 }
 0x3cb   : > { %v1293_v8 = vadd.f32 1.0, %v1292_v5  ;;  %1966 = vmatprep.mubr.msk.bf16.mxu0 %vm2080_vm5, %v2079_v2  ;;  %1933 = vmatpush3.bf16.msra.mxu1 %v2023_v9  ;;  %v1762_v36 = vld [vmem:[%s703_s26] ss:$0 sm:$0xff] }
 0x3cc   : > { %1934 = vmatprep.subr.bf16.mxu1 %v2079_v2  ;;  %1951 = vmatpush3.bf16.msra.mxu0 %v2030_v17  ;;  %v1771_v43 = vld [vmem:[%s711_s12] ss:$0 sm:$0xff] }
 0x3cd   : > { %1296 = vperm.xlu0 %2021, %v1293_v8   ;;  %1952 = vmatprep.subr.bf16.mxu0 %v2079_v2 }
 0x3cf   : > { %1935 = vmatpush3.bf16.msra.mxu1 %v2024_v20 }
 0x3d0   : > { %1936 = vmatprep.subr.bf16.mxu1 %v2079_v2  ;;  %1953 = vmatpush3.bf16.msra.mxu0 %v2031_v18 }
 0x3d1   : > { %1954 = vmatprep.subr.bf16.mxu0 %v2079_v2 }
 0x3d3   : > { %1937 = vmatpush3.bf16.msra.mxu1 %v2025_v10 }
 0x3d4   : > { %1938 = vmatprep.subr.bf16.mxu1 %v2079_v2  ;;  %1955 = vmatpush3.bf16.msra.mxu0 %v2032_v19 }
 0x3d5   : > { %1956 = vmatprep.subr.bf16.mxu0 %v2079_v2 }
 0x3d7   : > { %1939 = vmatpush3.bf16.msra.mxu1 %v2026_v11 }
 0x3d8   : > { %1940 = vmatprep.subr.bf16.mxu1 %v2079_v2  ;;  %1957 = vmatpush3.bf16.msra.mxu0 %v2033_v21 }
 0x3d9   : > { %1958 = vmatprep.subr.bf16.mxu0 %v2079_v2 }
 0x3db   : > { %1941 = vmatpush3.bf16.msra.mxu1 %v2027_v13 }
 0x3dc   : > { %1942 = vmatprep.subr.bf16.mxu1 %v2079_v2  ;;  %1959 = vmatpush3.bf16.msra.mxu0 %v2034_v22 }
 0x3dd   : > { %1960 = vmatprep.subr.bf16.mxu0 %v2079_v2 }
 0x3df   : > { %1943 = vmatpush3.bf16.msra.mxu1 %v2028_v15 }
 0x3e0   : > { %1944 = vmatprep.subr.bf16.mxu1 %v2079_v2  ;;  %1961 = vmatpush3.bf16.msra.mxu0 %v2035_v23 }
 0x3e1   : > { %1962 = vmatprep.subr.bf16.mxu0 %v2079_v2 }
 0x3e3   : > { %1945 = vmatpush3.bf16.msra.mxu1 %v2029_v16 }
 0x3e4   : > { %1963 = vmatpush3.bf16.msra.mxu0 %v2036_v33 }
 0x3e5   : > { %1964 = vmatprep.subr.bf16.mxu0 %v2079_v2 }
 0x3e8   : > { %1965 = vmatpush3.bf16.msra.mxu0 %v2037_v35 }
 0x44c   : > { %v1297_v24 = vpop.permute.xlu0 %1296 }
 0x44d   : > { %v1299_v25 = vmul.f32 %v1297_v24, %v2251_v3 }
 0x49d   : > { %v1337_v26 = vpop.f32.mrb[0].mxu0 }
 0x49e   : > { %v1338_v27 = vadd.f32 %v1337_v26, %v1299_v25  ;;  %v1928_v28 = vpop.f32.mrb[1].mxu0 }
 0x49f   : > { %v1340_v29 = vpop.f32.mrb[2].mxu0 }
 0x4a0   : > { %v1343_v31 = vpack.c.bf16 %v1338_v27, %v1338_v27  ;;  %v1929_v32 = vpop.f32.mrb[3].mxu0 }
 0x4a2   : > { %1947 = vmatmul.mubr.bf16.vlgmr.msra.gmra.mrb[0].mxu1 %v1343_v31 }
 0x575   : > { %v1449_v3 = vpop.f32.mrb[0].mxu1 }
 0x576   : > { %v1450_v37 = vadd.f32 %v1762_v36, %v1449_v3  ;;  %v1948_v38 = vpop.f32.mrb[1].mxu1 }
 0x577   : > { %v1452_v39 = vpop.f32.mrb[2].mxu1 }
 0x578   : > { %v1455_v40 = vmax.f32 %v1450_v37, 0.0  ;;  %v1949_v41 = vpop.f32.mrb[3].mxu1 }
 0x57a   : > { %v1456_v42 = vpack.c.bf16 %v1455_v40, %v1455_v40 }
 0x57c   : > { %1967 = vmatmul.mubr.bf16.vlgmr.msra.gmra.mrb[4].mxu0 %v1456_v42 }
 0x64f   : > { %v1562_v44 = vpop.f32.mrb[4].mxu0 }
 0x650   : > { %v1563_v45 = vadd.f32 %v1771_v43, %v1562_v44  ;;  %v1968_v46 = vpop.f32.mrb[5].mxu0 }
 0x651   : > { %v1565_v47 = vpop.f32.mrb[6].mxu0 }
 0x652   : > { %v1568_v48 = vmax.f32 %v1563_v45, 0.0  ;;  %v1969_v49 = vpop.f32.mrb[7].mxu0 }
 0x654   : > { %1569 = vst [vmem:[#allocation2] sm:$0x3] %v1568_v48 }
 0x655 PF: > { %p1977_p7 = scmp.eq.s32.totalorder %s2186_s28, 2  ;;  %s2082_s10 = smov [#allocation3]  }
 0x656   : > { %s1576_s26 = sshll.u32 %s2082_s10, 4  ;;  %s1577_s26 = int_to_ptr.vmem [resolvable:$true] %s1576_s26 }
 0x657   : > { %s2038_s0 = scalar_lea.vmem %s1577_s26, 256  ;;  %p2045_p11 = scmp.lt.s32.totalorder %s1577_s26, %s1577_s26 }
 0x658   : > { %p2039_p8 = scmp.ne.s32.totalorder %s1577_s26, %s2038_s0  ;;  %p2046_p12 = scmp.lt.s32.totalorder %s2038_s0, %s2038_s0 }
 0x65a   : > { %p2040_p9 = pnand %p2039_p8, %p1977_p7  ;;  %p2047_p13 = por %p2046_p12, %p2045_p11 }
 0x65c   : > { %p2041_p10 = pneg %p2040_p9 }
 0x65e   : > { %p2048_p0 = pnand %p2047_p13, %p2041_p10 }
 0x660   : > { %2051 = shalt.err (!%p2048_p0)
}
 0x661   : > { %s2512_s24 = sld [smem:[#allocation15_spill]] }
 0x667   : > { %s2052_s9 = scalar_lea.hbm %s2512_s24, 256 }
 0x668   : > { %p2053_p1 = scmp.ne.s32.totalorder %s2512_s24, %s2052_s9  ;;  %p2058_p4 = scmp.lt.u32.totalorder %s2052_s9, %s2512_s24 }
 0x66a   : > { %p2054_p2 = pnand %p2053_p1, %p1977_p7 }
 0x66c   : > { %p2055_p3 = pneg %p2054_p2 }
 0x66e   : > { %p2060_p5 = pnand %p2058_p4, %p2055_p3 }
 0x670   : > { %2063 = shalt.err (!%p2060_p5)
}
 0x671   : > { %s2083_s18 = smov 128   ;;  %s2084_s27 = smov 8  }
 0x672   : > { %1974 = dma.vmem_to_hbm [thread:$0]  (%p1977_p7), %s1577_s26, 256, %s2512_s24, [#allocation4], %s2083_s18, %s2083_s18, %s2084_s27  }
 0x673   : > { %2069 = dma.done.wait (%p1977_p7), [#allocation4], 256  }
 0x674   : > { %2071 = vsyncadd (%p1977_p7), [#allocation4], 4294967040 }
 0x675 PF: > { %s2513_s23 = sld [smem:[#allocation6_spill]] }
 0x67b   : > { %s29_s27 = sadd.s32 1, %s2513_s23  }
 0x67c   : > { %p26_p6 = scmp.ge.s32.totalorder %s29_s27, 5  }
 0x67e   :  { %28 = sbr.rel (!%p26_p6) target bundleno = 11 (0xb), region = 158 }
 0x685   :  { %1592 = vsyncpa [#allocation4], 1 }
 0x686   :  { %1594 = vsyncpa [#allocation4 + $0x1], 1 }

</bundles_post_ra>
